<compile_context>
chip_gen: v6e
topology: v6e:2x2x1
jax: 0.10.0
libtpu: 0.0.40
codegen_flags: <defaults>
</compile_context>

<pallas_src>
import math

import jax
import jax.numpy as jnp
from jax import lax
from jax.experimental import pallas as pl
from jax.experimental.pallas import tpu as pltpu


_TILE_BYTES = 4 * 1024 * 1024          # per-tile cap (1-4 MiB is the measured sweet spot)
_RESIDENT_P_BYTES = 8 * 1024 * 1024    # keep P fully VMEM-resident below this
_VMEM_LIMIT = 48 * 1024 * 1024         # <= ~48 MiB: safe on v7x (64 MiB / TC)


def make_positional_table(max_len: int, num_hiddens: int) -> jnp.ndarray:
    """(max_len, num_hiddens) sinusoidal table P (plain JAX glue, float32)."""
    pos = jnp.arange(max_len, dtype=jnp.float32).reshape(-1, 1)
    inv_freq = jnp.power(
        10000.0,
        jnp.arange(0, num_hiddens, 2, dtype=jnp.float32) / num_hiddens,
    )
    angles = pos / inv_freq                               # (max_len, ceil(H/2))
    P = jnp.zeros((max_len, num_hiddens), dtype=jnp.float32)
    P = P.at[:, 0::2].set(jnp.sin(angles))
    # Odd num_hiddens: cos fills only floor(H/2) columns (fixes shape mismatch).
    P = P.at[:, 1::2].set(jnp.cos(angles[:, : num_hiddens // 2]))
    return P


def _sublane_tile(itemsize: int) -> int:
    """Native packed sublane granularity: 8 rows f32, 16 bf16, 32 int8/fp8."""
    return 8 * max(1, 4 // max(1, itemsize))


def _choose_row_tile(S: int, H: int, itemsize: int,
                     target_bytes: int = _TILE_BYTES) -> int:
    """Largest sublane-aligned row count whose (rows, H) tile fits the budget."""
    sub = _sublane_tile(itemsize)
    rows = max(sub, (target_bytes // max(1, H * itemsize)) // sub * sub)
    if rows >= S:
        return S  # full extent -- always a legal block dim
    for cand in range(rows, sub - 1, -sub):   # prefer divisors: no edge blocks
        if S % cand == 0:
            return cand
    return rows  # non-divisor still correct (edge blocks handled by Pallas)


# ---------------------------------------------------------------------------
# Kernels
# ---------------------------------------------------------------------------

def _add_kernel(x_ref, p_ref, o_ref):
    # x: (TS, Hf) in x.dtype ; p: (TS, Hf) f32 ; add in f32, cast on store.
    o_ref[...] = (x_ref[...] + p_ref[...]).astype(o_ref.dtype)


def _make_resident_add_kernel(ts: int, p_rows: int):
    """P is fully VMEM-resident; slice the matching rows for this s-tile."""
    if p_rows == ts:
        return _add_kernel

    def kernel(x_ref, p_ref, o_ref):
        start = pl.multiple_of(pl.program_id(0) * ts, 8)   # ts is sublane-aligned
        o_ref[...] = (x_ref[...] + p_ref[pl.ds(start, ts), :]).astype(o_ref.dtype)

    return kernel


def _make_gen_add_kernel(ts: int, hf: int, fold: int, num_hiddens: int):
    """Opt-in: generate the P tile in-kernel (no P HBM stream).

    The table tile is rebuilt once per s-tile (pl.when(b == 0)) into a VMEM
    scratch and reused across the inner batch loop.
    """
    neg_log_1e4_over_h = -math.log(10000.0) / float(num_hiddens)

    def kernel(x_ref, o_ref, p_scr):
        s = pl.program_id(0)
        b = pl.program_id(1)

        @pl.when(b == 0)
        def _():
            r = lax.broadcasted_iota(jnp.float32, (ts, hf), 0)   # row in tile
            c = lax.broadcasted_iota(jnp.int32, (ts, hf), 1)     # folded column
            grp = c // num_hiddens                 # sub-row within the fold group
            hid = c - grp * num_hiddens            # original hidden index
            base = (s * (ts * fold)).astype(jnp.float32)
            pos = base + r * float(fold) + grp.astype(jnp.float32)
            k2 = ((hid // 2) * 2).astype(jnp.float32)
            angle = pos * jnp.exp(k2 * neg_log_1e4_over_h)
            p_scr[...] = jnp.where(hid % 2 == 0, jnp.sin(angle), jnp.cos(angle))

        o_ref[...] = (x_ref[...] + p_scr[...]).astype(o_ref.dtype)

    return kernel


# ---------------------------------------------------------------------------
# Wrapper
# ---------------------------------------------------------------------------

def positional_encoding_forward(x: jnp.ndarray, P: jnp.ndarray,
                                *, compute_p_in_kernel: bool = False,
                                in_place: bool = False) -> jnp.ndarray:
    """x: [B, S, H]; P: [max_len, H] (f32). Returns x + P[:S] (eval-mode dropout)."""
    B, S, H = x.shape
    dtype = x.dtype
    assert S <= P.shape[0], "sequence length exceeds max_len of the table"
    P_s = P[:S, :].astype(jnp.float32)

    # Lane-dense folding (+ row padding so the fold is exact and stores are
    # unmasked full-lane vst instead of masked vst.msk).
    fold, pad_rows = 1, 0
    if H % 128 != 0:
        f = math.lcm(H, 128) // H
        pad = (-S) % f
        if pad == 0 or pad <= S:        # avoid >2x blow-up for tiny S
            fold, pad_rows = f, pad

    if fold > 1:
        x_p, P_p = x, P_s
        if pad_rows:
            x_p = jnp.pad(x_p, ((0, 0), (0, pad_rows), (0, 0)))
            P_p = jnp.pad(P_p, ((0, pad_rows), (0, 0)))
        Sf, Hf = (S + pad_rows) // fold, H * fold
        x_k = x_p.reshape(B, Sf, Hf)
        P_k = P_p.reshape(Sf, Hf)
    else:
        Sf, Hf = S, H
        x_k, P_k = x, P_s

    TS = _choose_row_tile(Sf, Hf, jnp.dtype(dtype).itemsize)
    grid_s = pl.cdiv(Sf, TS)

    x_spec = pl.BlockSpec((pl.Squeezed(), TS, Hf), lambda s, b: (b, s, 0))
    out_spec = pl.BlockSpec((pl.Squeezed(), TS, Hf), lambda s, b: (b, s, 0))
    io_aliases = {0: 0} if in_place else {}

    if compute_p_in_kernel:
        # No P HBM stream: table generated in-kernel (sin/cos on EUP/VPU slack).
        kernel = _make_gen_add_kernel(TS, Hf, fold, H)
        out = pl.pallas_call(
            kernel,
            out_shape=jax.ShapeDtypeStruct((B, Sf, Hf), dtype),
            grid_spec=pltpu.PrefetchScalarGridSpec(
                num_scalar_prefetch=0,
                grid=(grid_s, B),                 # s outermost, batch innermost
                in_specs=[x_spec],
                out_specs=out_spec,
                scratch_shapes=[pltpu.VMEM((TS, Hf), jnp.float32)],
            ),
            compiler_params=pltpu.CompilerParams(
                # batch axis must not be core-sharded: scratch P is rebuilt
                # only at b == 0 of each s-tile.
                dimension_semantics=("parallel", "arbitrary"),
                vmem_limit_bytes=_VMEM_LIMIT,
            ),
            input_output_aliases=io_aliases,
        )(x_k)
    else:
        resident = grid_s * TS * Hf * 4 <= _RESIDENT_P_BYTES
        if resident:
            p_rows = grid_s * TS
            if p_rows != Sf:                       # pad so in-kernel pl.ds stays in-bounds
                P_k = jnp.pad(P_k, ((0, p_rows - Sf), (0, 0)))
            p_spec = pl.BlockSpec((p_rows, Hf), lambda s, b: (0, 0))   # fetched once
            kernel = _make_resident_add_kernel(TS, p_rows)
        else:
            p_spec = pl.BlockSpec((TS, Hf), lambda s, b: (s, 0))
            kernel = _add_kernel

        out = pl.pallas_call(
            kernel,
            out_shape=jax.ShapeDtypeStruct((B, Sf, Hf), dtype),
            grid_spec=pltpu.PrefetchScalarGridSpec(
                num_scalar_prefetch=0,
                grid=(grid_s, B),                 # s outermost, batch innermost
                in_specs=[x_spec, p_spec],
                out_specs=out_spec,
            ),
            compiler_params=pltpu.CompilerParams(
                dimension_semantics=("parallel", "parallel"),
                vmem_limit_bytes=_VMEM_LIMIT,
            ),
            input_output_aliases=io_aliases,
        )(x_k, P_k)

    if fold > 1:
        out = out.reshape(B, S + pad_rows, H)
        if pad_rows:
            out = out[:, :S, :]
    return out


if __name__ == "__main__":
    # Small shapes consistent with the module's forward.
    batch, seq, num_hiddens, max_len = 2, 8, 32, 16
    dropout = 0.1  # eval mode -> identity

    key = jax.random.PRNGKey(0)
    x = jax.random.normal(key, (batch, seq, num_hiddens), dtype=jnp.float32)

    P = make_positional_table(max_len, num_hiddens)

    # Reference computed before the call (safe even if in_place were enabled).
    ref = x + P[None, :seq, :]

    out = positional_encoding_forward(x, P)
    out = jax.block_until_ready(out)

    assert out.shape == (batch, seq, num_hiddens)
    assert jnp.allclose(out, ref, atol=1e-6), "mismatch vs reference"

    print("KERNEL_OK")
</pallas_src>

<mosaic_0001>
module attributes {stable_mosaic.version = 11 : i64} {
  func.func @_add_kernel(%arg0: i32, %arg1: i32, %arg2: memref<1x2x128xf32, #tpu.memory_space<vmem>>, %arg3: memref<2x128xf32, #tpu.memory_space<vmem>>, %arg4: memref<1x2x128xf32, #tpu.memory_space<vmem>>) attributes {dimension_semantics = [#tpu.dimension_semantics<parallel>, #tpu.dimension_semantics<parallel>], iteration_bounds = array<i64: 1, 2>, scalar_prefetch = 0 : i64, scratch_operands = 0 : i64, tpu.core_type = #tpu.core_type<tc>, window_params = [{transform_indices = @transform_0, window_bounds = array<i64: 1, 2, 128>}, {pipeline_mode = #tpu.pipeline_mode<synchronous>, transform_indices = @transform_1, window_bounds = array<i64: 2, 128>}, {transform_indices = @transform_2, window_bounds = array<i64: 1, 2, 128>}]} {
    %c0 = arith.constant 0 : index
    %c0_0 = arith.constant 0 : index
    %c0_1 = arith.constant 0 : index
    %0 = vector.load %arg2[%c0, %c0_0, %c0_1] : memref<1x2x128xf32, #tpu.memory_space<vmem>>, vector<1x2x128xf32>
    %1 = vector.shape_cast %0 : vector<1x2x128xf32> to vector<2x128xf32>
    %c0_2 = arith.constant 0 : index
    %c0_3 = arith.constant 0 : index
    %2 = vector.load %arg3[%c0_2, %c0_3] : memref<2x128xf32, #tpu.memory_space<vmem>>, vector<2x128xf32>
    %3 = arith.addf %1, %2 : vector<2x128xf32>
    %c0_4 = arith.constant 0 : index
    %c0_5 = arith.constant 0 : index
    %c0_6 = arith.constant 0 : index
    %4 = vector.load %arg4[%c0_4, %c0_5, %c0_6] : memref<1x2x128xf32, #tpu.memory_space<vmem>>, vector<1x2x128xf32>
    %5 = vector.shape_cast %4 : vector<1x2x128xf32> to vector<2x128xf32>
    %6 = vector.shape_cast %3 : vector<2x128xf32> to vector<1x2x128xf32>
    tpu.vector_store %arg4[%c0_4, %c0_5, %c0_6], %6 {strides = array<i32>} : memref<1x2x128xf32, #tpu.memory_space<vmem>>, vector<1x2x128xf32>,
    return
  }
  func.func @transform_0(%arg0: i32, %arg1: i32) -> (i32, i32, i32) {
    %c0_i32 = arith.constant 0 : i32
    %c0_i32_0 = arith.constant 0 : i32
    return %arg1, %arg0, %c0_i32 : i32, i32, i32
  }
  func.func @transform_1(%arg0: i32, %arg1: i32) -> (i32, i32) {
    %c0_i32 = arith.constant 0 : i32
    %c0_i32_0 = arith.constant 0 : i32
    %c0_i32_1 = arith.constant 0 : i32
    return %c0_i32, %c0_i32_0 : i32, i32
  }
  func.func @transform_2(%arg0: i32, %arg1: i32) -> (i32, i32, i32) {
    %c0_i32 = arith.constant 0 : i32
    %c0_i32_0 = arith.constant 0 : i32
    return %arg1, %arg0, %c0_i32 : i32, i32, i32
  }
}

</mosaic_0001>

<bundles_post_ra>
// kernel: tpu_custom_call.1
= control target key start
LH: loop header
LB: loop body
LE: loop exit
PB: predicated region body
PF: predicated region fallthrough
CT: control target
= control target key end

     0   :  { %7 = vsyncpa [#allocation3], 0  ;;  %s705_s0 = inlined_call_operand.hbm [shape: f32[2,2,128], index: 0, kind: input, shape index: {}]   ;;  %s706_s1 = inlined_call_operand.hbm [shape: f32[2,128], index: 1, kind: input, shape index: {}]   ;;  %s707_s2 = inlined_call_operand.hbm [shape: f32[2,2,128], index: 2, kind: output, shape index: {}]  }
   0x1   :  { %9 = vsyncpa [#allocation3 + $0x1], 0 }
   0x2   :  { %10 = vsyncpa [#allocation6], 0 }
   0x3   :  { %11 = vsyncpa [#allocation4], 0 }
   0x4   :  { %13 = vsyncpa [#allocation4 + $0x1], 0  ;;  %s544_s9 = smov 0   ;;  %s546_s10 = smov 0  }
   0x5   :  { %s548_s11 = smov 0   ;;  %s550_s12 = smov 0  }
   0x6   :  { %s552_s13 = smov 0   ;;  %s554_s14 = smov 0  }
   0x7 LB: > { %s298_s15 = sadd.s32 4294967295, %s524_s14   ;;  %s299_s16 = sadd.s32 4294967294, %s524_s14   ;;  %s524_s14 = sphi %s554_s14, %s19_s14   ;;  %s520_s13 = sphi %s552_s13, %s724_s13   ;;  %s516_s12 = sphi %s550_s12, %s723_s12   ;;  %s512_s11 = sphi %s548_s11, %s722_s11   ;;  %s508_s10 = sphi %s546_s10, %s721_s10   ;;  %s504_s9 = sphi %s544_s9, %s720_s9  }
   0x8   : > { %p53_p0 = scmp.ne.s32.totalorder %s508_s10, %s504_s9  ;;  %p578_p1 = scmp.eq.s32.totalorder %s298_s15, 0 }
   0x9   : > { %p582_p2 = scmp.eq.s32.totalorder %s298_s15, 1  ;;  %p106_p3 = scmp.eq.s32.totalorder %s299_s16, 1 }
   0xa   : > { %p588_p4 = por %p578_p1, %p53_p0  ;;  %p300_p5 = scmp.ge.s32.totalorder %s524_s14, 1 }
   0xb   : > { %p593_p6 = por %p106_p3, %p53_p0  ;;  %p113_p7 = scmp.lt.s32.totalorder %s524_s14, 3 }
   0xc   : > { %s711_s19 = scalar_select %p588_p4, 1, 0 }
   0xd   : > { %s712_s20 = scalar_select %p593_p6, 1, 0 }
   0xe   : > { %p598_p8 = pnand %p300_p5, %p113_p7  ;;  %s526_s22 = smov [#allocation5]  }
   0xf   : > { %s126_s23 = sshll.u32 %s526_s22, 4  ;;  %s28_s25 = sadd.s32 1, %s520_s13  ;;  %s127_s23 = int_to_ptr.vmem [resolvable:$true] %s126_s23 }
  0x10   : > { %p321_p10 = pneg %p598_p8  ;;  %s40_s26 = sadd.s32 1, %s512_s11 }
  0x11   : > { %p29_p12 = scmp.ge.s32.totalorder %s28_s25, 2  ;;  %s397_s27 = scalar_lea.vmem %s127_s23, 32 }
  0x12   : > { %p607_p11 = pnand %p321_p10, %p578_p1  ;;  %p398_p0 = scmp.ne.s32.totalorder %s127_s23, %s397_s27 }
  0x13   : > { %p405_p7 = scmp.lt.s32.totalorder %s127_s23, %s127_s23  ;;  %p406_p6 = scmp.lt.s32.totalorder %s397_s27, %s397_s27 }
  0x14   : > { %p388_p13 = pneg %p607_p11 }
  0x15   : > { %p407_p9 = por %p406_p6, %p405_p7 }
  0x16   : > { %p400_p3 = pnand %p398_p0, %p388_p13 }
  0x18   : > { %p401_p5 = pneg %p400_p3 }
  0x1a   : > { %p408_p4 = pnand %p407_p9, %p401_p5 }
  0x1c   : > { %411 = shalt.err (!%p408_p4)
}
  0x1d   : > { %324 = dma.hbm_to_vmem [thread:$0]  (!%p607_p11), %s706_s1, 32, %s127_s23, [#allocation6]  }
  0x1e   : > { %s726_s25 = smov (%p29_p12, %s28_s25), 0  ;;  %p47_p6 = scmp.ne.s32.totalorder %s512_s11, %s508_s10 }
  0x1f   : > { %p48_p4 = scmp.eq.s32.totalorder %s524_s14, 0  ;;  %s35_s30 = ssub.s32 %s520_s13, %s726_s25 }
  0x20   : > { %p334_p9 = scmp.lt.s32.totalorder %s524_s14, 2  ;;  %p38_p10 = scmp.eq.s32.totalorder %s35_s30, 0 }
  0x21   : > { %p49_p13 = por %p48_p4, %p47_p6  ;;  %p630_p0 = por %p582_p2, %p47_p6 }
  0x22   : > { %s137_s4 = sand.u32 1, %s512_s11   ;;  %s304_s7 = sshll.u32 %s520_s13, 5 }
  0x23   : > { %s636_s5 = scalar_select %p38_p10, %s512_s11, %s40_s26  }
  0x24   : > { %s303_s6 = sshll.u32 %s137_s4, 1  ;;  %s147_s16 = scalar_lea.hbm %s705_s0, %s304_s7 }
  0x25   : > { %s141_s22 = scalar_lea.vmem [#allocation2], %s303_s6  ;;  %p642_p11 = pnand %p334_p9, %p49_p13 }
  0x26   : > { %s149_s23 = sshll.u32 %s141_s22, 4  ;;  %s138_s18 = scalar_lea.sflag [#allocation3], %s137_s4  ;;  %s150_s23 = int_to_ptr.vmem [resolvable:$true] %s149_s23 }
  0x27   : > { %p414_p2 = pneg %p642_p11  ;;  %s425_s27 = scalar_lea.vmem %s150_s23, 32 }
  0x28   : > { %p426_p12 = scmp.ne.s32.totalorder %s150_s23, %s425_s27  ;;  %s527_s26 = smov [#allocation2]  }
  0x29   : > { %s430_s28 = sshll.u32 %s527_s26, 4  ;;  %s431_s28 = int_to_ptr.vmem [resolvable:$false] %s430_s28 }
  0x2a   : > { %p428_p3 = pnand %p426_p12, %p414_p2  ;;  %s432_s29 = scalar_lea.vmem %s431_s28, 64 }
  0x2b   : > { %p433_p7 = scmp.lt.s32.totalorder %s150_s23, %s431_s28  ;;  %p434_p6 = scmp.lt.s32.totalorder %s432_s29, %s425_s27 }
  0x2c   : > { %p429_p5 = pneg %p428_p3 }
  0x2d   : > { %p435_p4 = por %p434_p6, %p433_p7 }
  0x2f   : > { %p436_p10 = pnand %p435_p4, %p429_p5 }
  0x31   : > { %439 = shalt.err (!%p436_p10)
}
  0x32   : > { %328 = dma.hbm_to_vmem [thread:$0]  (!%p642_p11), %s147_s16, 32, %s150_s23, %s138_s18  }
  0x33   : > { %158 = sbr.rel (%p598_p8) target bundleno = 83 (0x53), region = 28  ;;  %s653_s30 = sand.u32 (!%p598_p8), 1, %s508_s10  }
  0x34   : > { %s306_s4 = sshll.u32 (!%p598_p8), %s653_s30, 1  ;;  %s161_s6 = scalar_lea.sflag (!%p598_p8), [#allocation3], %s653_s30 }
  0x35   : > { %s164_s7 = scalar_lea.vmem (!%p598_p8), [#allocation2], %s306_s4  ;;  %p717_p9 = scmp.ne.s32.totalorder (!%p598_p8), %s711_s19, 0 }
  0x38   : > { %491 = dma.done.wait (%p717_p9), %s161_s6, 32  }
  0x39   : > { %493 = vsyncadd (%p717_p9), %s161_s6, 4294967264 }
  0x3a   : > { %495 = dma.done.wait (%p578_p1), [#allocation6], 32  }
  0x3b   : > { %497 = vsyncadd (%p578_p1), [#allocation6], 4294967264  ;;  %s188_s21 = scalar_lea.vmem [#allocation7], %s306_s4  ;;  %s310_s15 = sshll.u32 %s516_s12, 5  ;;  %v189_v0 = vld [vmem:[%s164_s7] sm:$0x3] }
  0x3c   : > { %s208_s8 = sshll.u32 %s188_s21, 4  ;;  %v190_v1 = vld [vmem:[#allocation5] sm:$0x3]  ;;  %s206_s19 = scalar_lea.hbm %s707_s2, %s310_s15  ;;  %s209_s8 = int_to_ptr.vmem [resolvable:$true] %s208_s8 }
  0x3d   : > { %v191_v2 = vadd.f32 %v190_v1, %v189_v0  ;;  %s194_s23 = scalar_lea.sflag [#allocation4], %s653_s30  ;;  %s440_s24 = scalar_lea.vmem %s209_s8, 32 }
  0x3e   : > { %p441_p8 = scmp.ne.s32.totalorder %s209_s8, %s440_s24  ;;  %s528_s17 = smov [#allocation7]  }
  0x3f   : > { %192 = vst [vmem:[%s188_s21] sm:$0x3] %v191_v2  ;;  %s444_s18 = sshll.u32 %s528_s17, 4  ;;  %s445_s18 = int_to_ptr.vmem [resolvable:$false] %s444_s18 }
  0x40   : > { %p442_p1 = pnand %p441_p8, %p630_p0  ;;  %s446_s27 = scalar_lea.vmem %s445_s18, 64 }
  0x41   : > { %p447_p11 = scmp.lt.s32.totalorder %s209_s8, %s445_s18  ;;  %p448_p2 = scmp.lt.s32.totalorder %s446_s27, %s440_s24 }
  0x42   : > { %p443_p13 = pneg %p442_p1 }
  0x43   : > { %p449_p12 = por %p448_p2, %p447_p11 }
  0x45   : > { %p450_p3 = pnand %p449_p12, %p443_p13 }
  0x47   : > { %453 = shalt.err (!%p450_p3)
}
  0x48   : > { %s454_s12 = scalar_lea.hbm %s206_s19, 32  ;;  %s458_s29 = scalar_lea.hbm %s707_s2, 64 }
  0x49   : > { %p455_p5 = scmp.ne.s32.totalorder %s206_s19, %s454_s12  ;;  %p459_p4 = scmp.lt.s32.totalorder %s206_s19, %s707_s2 }
  0x4a   : > { %p460_p10 = scmp.lt.s32.totalorder %s458_s29, %s454_s12 }
  0x4b   : > { %p456_p7 = pnand %p455_p5, %p630_p0 }
  0x4c   : > { %p461_p9 = por %p460_p10, %p459_p4 }
  0x4d   : > { %p457_p6 = pneg %p456_p7 }
  0x4f   : > { %p462_p8 = pnand %p461_p9, %p457_p6 }
  0x51   : > { %465 = shalt.err (!%p462_p8)
}
  0x52   : > { %319 = dma.vmem_to_hbm [thread:$0]  (%p630_p0), %s209_s8, 32, %s206_s19, %s194_s23  }
  0x53 PF: > { %s220_s6 = sand.u32 1, %s504_s9   ;;  %p718_p1 = scmp.ne.s32.totalorder %s712_s20, 0 }
  0x54   : > { %p719_p13 = scmp.ge.s32.totalorder %s524_s14, 2  ;;  %s221_s7 = scalar_lea.sflag [#allocation4], %s220_s6 }
  0x56   : > { %p330_p11 = pnand %p719_p13, %p718_p1 }
  0x58   : > { %p331_p2 = pneg %p330_p11 }
  0x5a   : > { %499 = dma.done.wait (%p331_p2), %s221_s7, 32  }
  0x5b   : > { %501 = vsyncadd (%p331_p2), %s221_s7, 4294967264  ;;  %s19_s14 = sadd.s32 1, %s524_s14   ;;  %s720_s9 = smov %s508_s10 }
  0x5c   : > { %p16_p12 = scmp.ge.s32.totalorder %s19_s14, 4   ;;  %s721_s10 = smov %s512_s11 }
  0x5d   : > { %s722_s11 = smov %s636_s5  ;;  %s723_s12 = smov %s520_s13 }
  0x5e   : > { %s724_s13 = smov %s726_s25  ;;  %18 = sbr.rel (!%p16_p12) target bundleno = 7 (0x7), region = 77 }
  0x63   :  { %226 = vsyncpa [#allocation3], 1 }
  0x64   :  { %228 = vsyncpa [#allocation3 + $0x1], 1 }
  0x65   :  { %229 = vsyncpa [#allocation6], 1 }
  0x66   :  { %230 = vsyncpa [#allocation4], 1 }
  0x67   :  { %232 = vsyncpa [#allocation4 + $0x1], 1 }

</bundles_post_ra>
